<compile_context>
chip_gen: v7x
topology: tpu7x:2x2x1
jax: 0.10.0
libtpu: 0.0.40
codegen_flags: <defaults>
</compile_context>

<pallas_src>
import functools
import numpy as np
import jax
import jax.numpy as jnp
from jax.experimental import pallas as pl
from jax.experimental.pallas import tpu as pltpu

# ----------------------------- configuration --------------------------------
EMB_DIM = 32                      # hierarchicalClustering.input_dim (task emb dim)
HID_DIM = 32                      # hierarchicalClustering.hidden_dim
K_PAD = 128                       # padded contraction dim for the gate matmuls (MXU K)
CLUSTER_L0 = 4
CLUSTER_L1 = 2
TILE_P_MAX = 8192                 # hard cap on columns per grid step
VMEM_TILE_BUDGET = 12 * 1024 * 1024   # tiling budget: fits v5e's 16 MiB scoped default
VMEM_LIMIT_BYTES = 16 * 1024 * 1024   # explicit scoped-VMEM limit (safe on v5e/v6e/v7x)

# tiny synthetic MAML module parameter shapes (conv weights are OIHW like torch)
MAML_PARAM_SHAPES = {
    "conv1.weight": (4, 3, 3, 3),
    "conv1.bias": (4,),
    "logits.weight": (5, 4),
    "logits.bias": (5,),
}
PARAM_NUMELS = {k: int(np.prod(s)) for k, s in MAML_PARAM_SHAPES.items()}
TOTAL_NUMEL = sum(PARAM_NUMELS.values())
P_PAD = pl.cdiv(TOTAL_NUMEL, 128) * 128


# ----------------------------- Pallas kernel ---------------------------------
def _adaptor_gate_kernel(v_ref, hw_ref, we_ref, wh_ref, bt_ref, out_ref):
    # v_ref:   [B_pad, K_PAD]  bf16  task embedding (zero-padded cols EMB_DIM..K_PAD)
    # hw_ref:  [K_PAD, K_PAD]  bf16  meta-knowledge projection Hw (zero-padded)
    # we_ref:  [K_PAD, tile_p] bf16  packed adaptor weights acting on the e-part
    # wh_ref:  [K_PAD, tile_p] bf16  packed adaptor weights acting on the h-part
    # bt_ref:  [2, tile_p]     f32   row 0 = packed adaptor biases, row 1 = flattened theta_0
    # out_ref: [B_pad, tile_p] f32   eta * theta_0 (adapted weights, flattened)
    v = v_ref[...]
    # meta-knowledge: tanh(e @ Hw)  (f32 accumulate + f32 tanh; padded cols stay 0)
    meta_h = jnp.tanh(jnp.dot(v, hw_ref[...], preferred_element_type=jnp.float32))
    # split gate matmul: logits = e @ We + h @ Wh  (bf16 MXU inputs, f32 accumulation)
    logits = jnp.dot(v, we_ref[...], preferred_element_type=jnp.float32)
    logits = logits + jnp.dot(meta_h.astype(jnp.bfloat16), wh_ref[...],
                              preferred_element_type=jnp.float32)
    eta = jax.nn.sigmoid(logits + bt_ref[0:1, :])     # f32 VPU add + EUP sigmoid
    out_ref[...] = eta * bt_ref[1:2, :]               # gate theta_0


def _pick_tile_p(b_pad, k_pad, p_pad):
    """Column tile from a VMEM budget (double-buffered We/Wh/bt/out + resident LHS/Hw)."""
    resident = b_pad * k_pad * 2 + k_pad * k_pad * 2            # v + Hw, bf16, VMEM-resident
    per_col = (2 * (2 * k_pad * 2)                              # We + Wh bf16, double-buffered
               + 2 * (2 * 4)                                    # bt f32 rows, double-buffered
               + 2 * (b_pad * 4))                               # out f32, double-buffered
    avail = max(VMEM_TILE_BUDGET - resident, per_col * 128)
    tile = min(p_pad, TILE_P_MAX, (avail // per_col) // 128 * 128)
    tile = max(tile, 128)
    while p_pad % tile != 0:                                    # keep the grid exact
        tile -= 128
    return tile


def adaptor_gate(v_bf16, hw_bf16, we_bf16, wh_bf16, bt_packed):
    """v: [B_pad,K_PAD] bf16, Hw: [K_PAD,K_PAD] bf16, We/Wh: [K_PAD,P_PAD] bf16,
    bt: [2,P_PAD] f32 -> [B_pad, P_PAD] f32 adapted (gated) flattened parameters."""
    b_pad, k_pad = v_bf16.shape
    p_pad = we_bf16.shape[1]
    tile_p = _pick_tile_p(b_pad, k_pad, p_pad)
    grid_n = p_pad // tile_p

    flops = 2 * b_pad * k_pad * (2 * p_pad + k_pad)             # two gate matmuls + Hw matmul
    transcendentals = b_pad * (p_pad + k_pad)                   # sigmoid + tanh
    bytes_accessed = (v_bf16.size * 2 + hw_bf16.size * 2 + we_bf16.size * 2
                      + wh_bf16.size * 2 + bt_packed.size * 4 + b_pad * p_pad * 4)

    return pl.pallas_call(
        _adaptor_gate_kernel,
        out_shape=jax.ShapeDtypeStruct((b_pad, p_pad), jnp.float32),
        grid_spec=pl.GridSpec(
            grid=(grid_n,),
            in_specs=[
                pl.BlockSpec((b_pad, k_pad), lambda j: (0, 0)),   # LHS stays VMEM-resident
                pl.BlockSpec((k_pad, k_pad), lambda j: (0, 0)),   # Hw stays VMEM-resident
                pl.BlockSpec((k_pad, tile_p), lambda j: (0, j)),
                pl.BlockSpec((k_pad, tile_p), lambda j: (0, j)),
                pl.BlockSpec((2, tile_p), lambda j: (0, j)),
            ],
            out_specs=pl.BlockSpec((b_pad, tile_p), lambda j: (0, j)),
        ),
        compiler_params=pltpu.CompilerParams(
            # multi-step column grid is embarrassingly parallel -> shard across v7x's 2 TCs;
            # keep a single-step grid on one core (sub-us kernel).
            dimension_semantics=("parallel",) if grid_n > 1 else ("arbitrary",),
            vmem_limit_bytes=VMEM_LIMIT_BYTES),
        cost_estimate=pl.CostEstimate(flops=flops,
                                      transcendentals=transcendentals,
                                      bytes_accessed=bytes_accessed),
    )(v_bf16, hw_bf16, we_bf16, wh_bf16, bt_packed)


# ----------------------- synthetic sub-modules (glue) ------------------------
def init_submodule_params(key, img_feat_dim):
    ks = jax.random.split(key, 5)
    return {
        # task embedding: flattened image + label -> EMB_DIM, plus a decoder for the recon loss
        "emb_w": 0.05 * jax.random.normal(ks[0], (img_feat_dim + 1, EMB_DIM), jnp.float32),
        "dec_w": 0.05 * jax.random.normal(ks[1], (EMB_DIM, img_feat_dim), jnp.float32),
        # hierarchical clustering: meta knowledge h, soft assigns, gates
        "hc_h_w": 0.1 * jax.random.normal(ks[2], (EMB_DIM, HID_DIM), jnp.float32),
        "hc_assign_w": 0.1 * jax.random.normal(ks[3], (EMB_DIM, CLUSTER_L0), jnp.float32),
        "hc_gate_w": 0.1 * jax.random.normal(ks[4], (EMB_DIM, CLUSTER_L0 * CLUSTER_L1), jnp.float32),
    }


def init_maml_and_adaptors(key):
    keys = jax.random.split(key, 3 * len(MAML_PARAM_SHAPES))
    maml_params = {}
    we_cols, wh_cols, b_cols = [], [], []
    for i, (name, shape) in enumerate(MAML_PARAM_SHAPES.items()):
        numel = PARAM_NUMELS[name]
        maml_params[name] = 0.1 * jax.random.normal(keys[3 * i], shape, jnp.float32)
        # torch nn.Linear(EMB+HID, numel): y = [e, h] @ W.T + b; store W.T split into e/h parts
        w_t = 0.1 * jax.random.normal(keys[3 * i + 1], (EMB_DIM + HID_DIM, numel), jnp.float32)
        we_cols.append(w_t[:EMB_DIM])
        wh_cols.append(w_t[EMB_DIM:])
        b_cols.append(0.01 * jax.random.normal(keys[3 * i + 2], (numel,), jnp.float32))
    we_all = jnp.concatenate(we_cols, axis=1)                 # [EMB_DIM, TOTAL_NUMEL]
    wh_all = jnp.concatenate(wh_cols, axis=1)                 # [HID_DIM, TOTAL_NUMEL]
    b_all = jnp.concatenate(b_cols, axis=0)                   # [TOTAL_NUMEL]
    we_packed = jnp.zeros((K_PAD, P_PAD), jnp.float32).at[:EMB_DIM, :TOTAL_NUMEL].set(we_all)
    wh_packed = jnp.zeros((K_PAD, P_PAD), jnp.float32).at[:HID_DIM, :TOTAL_NUMEL].set(wh_all)
    b_packed = jnp.zeros((P_PAD,), jnp.float32).at[:TOTAL_NUMEL].set(b_all)
    return maml_params, we_packed, wh_packed, b_packed


# --------------------------- TaskSpecific.forward ----------------------------
@functools.partial(jax.jit, static_argnames=("detach_theta0",))
def _forward_core(sub_params, maml_params, we_packed, wh_packed, b_packed,
                  xs_batch, ys_batch, detach_theta0=False):
    """Batched glue (task embedding + hierarchical clustering) + fused Pallas adaptor gate.

    Everything -- including the per-task parameter unpacking -- happens inside one jit,
    so the whole forward is a single XLA dispatch + one Pallas custom call.
    """
    bs, N, K = xs_batch.shape[:3]
    nk = N * K

    # ---- task embedding (batched over all tasks at once) ----
    x_flat = xs_batch.reshape(bs, nk, -1)                                     # [bs, N*K, C*H*W]
    feats = jnp.concatenate(
        [x_flat, ys_batch.reshape(bs, nk, 1).astype(jnp.float32)], axis=-1)   # [bs, N*K, F+1]
    img_emb = jnp.tanh(jnp.einsum("bnf,fe->bne", feats, sub_params["emb_w"])) # [bs, N*K, E]
    task_emb_vec = jnp.mean(img_emb, axis=1)                                  # [bs, EMB_DIM]
    recon = jnp.einsum("bne,ef->bnf", img_emb, sub_params["dec_w"])
    task_emb_loss = jnp.mean((recon - x_flat) ** 2, axis=(1, 2))              # [bs]

    # hierarchical-clustering soft assigns / gates: only consumed by the medium_record=True
    # path in the original module; unused here (medium_record=False) so XLA DCEs them.
    assign = jax.nn.softmax(task_emb_vec @ sub_params["hc_assign_w"], axis=-1)
    gates = jax.nn.softmax(
        (task_emb_vec @ sub_params["hc_gate_w"]).reshape(bs, CLUSTER_L0, CLUSTER_L1), axis=-1)
    del assign, gates

    # ---- pack theta_0 + biases, pad batch/contraction dims, run fused gate kernel ----
    theta_flat = jnp.concatenate([maml_params[k].reshape(-1) for k in MAML_PARAM_SHAPES])
    if detach_theta0:
        theta_flat = jax.lax.stop_gradient(theta_flat)
    bt_packed = (jnp.zeros((2, P_PAD), jnp.float32)
                 .at[0].set(b_packed)
                 .at[1, :TOTAL_NUMEL].set(theta_flat))                        # [2, P_PAD]

    # bf16 sublane packing is 16 rows -> pad the task batch to a multiple of 16
    b_pad = max(16, ((bs + 15) // 16) * 16)
    v_pad = (jnp.zeros((b_pad, K_PAD), jnp.bfloat16)
             .at[:bs, :EMB_DIM].set(task_emb_vec.astype(jnp.bfloat16)))
    hw_pad = (jnp.zeros((K_PAD, K_PAD), jnp.bfloat16)
              .at[:EMB_DIM, :HID_DIM].set(sub_params["hc_h_w"].astype(jnp.bfloat16)))

    adapted_flat = adaptor_gate(v_pad, hw_pad,
                                we_packed.astype(jnp.bfloat16),
                                wh_packed.astype(jnp.bfloat16),
                                bt_packed)                                    # [b_pad, P_PAD]

    # ---- unpack into per-task parameter dicts INSIDE jit (static slices/reshapes) ----
    adapted_weights_batch = []
    for mb in range(bs):
        adapted = {}
        offset = 0
        for name, shape in MAML_PARAM_SHAPES.items():
            numel = PARAM_NUMELS[name]
            adapted[name] = adapted_flat[mb, offset:offset + numel].reshape(shape)
            offset += numel
        adapted_weights_batch.append(adapted)

    return task_emb_loss, adapted_weights_batch


def task_specific_forward(sub_params, maml_params, we_packed, wh_packed, b_packed,
                          xs_batch, ys_batch, detach_theta0=False):
    task_emb_loss_batch, adapted_weights_batch = _forward_core(
        sub_params, maml_params, we_packed, wh_packed, b_packed,
        xs_batch, ys_batch, detach_theta0=detach_theta0)
    medium_batch = {'img_emb': [], 'task_emb_vec': [], 'meta_knowledge_h': [],
                    'etas': [], 'assigns': [], 'gates': []}   # medium_record=False path
    return task_emb_loss_batch, adapted_weights_batch, medium_batch


# --------------------------------- main --------------------------------------
if __name__ == "__main__":
    key = jax.random.PRNGKey(0)
    k_x, k_y, k_sub, k_maml = jax.random.split(key, 4)

    bs, N, K, C, H, W = 2, 2, 2, 3, 8, 8
    xs_batch = jax.random.normal(k_x, (bs, N, K, C, H, W), jnp.float32)
    ys_batch = jax.random.randint(k_y, (bs, N, K), 0, N)

    sub_params = init_submodule_params(k_sub, img_feat_dim=C * H * W)
    maml_params, we_packed, wh_packed, b_packed = init_maml_and_adaptors(k_maml)

    loss_batch, adapted_batch, medium = task_specific_forward(
        sub_params, maml_params, we_packed, wh_packed, b_packed, xs_batch, ys_batch)

    jax.block_until_ready(loss_batch)
    for aw in adapted_batch:
        for v in aw.values():
            jax.block_until_ready(v)

    # light sanity: adapted shapes match MAML parameter shapes; eta in (0,1) implies |adapted| <= |theta|
    for aw in adapted_batch:
        for name, shape in MAML_PARAM_SHAPES.items():
            assert aw[name].shape == shape
            assert bool(jnp.all(jnp.abs(aw[name]) <= jnp.abs(maml_params[name]) + 1e-6))

    print("KERNEL_OK")
</pallas_src>

<mosaic_0001>
module attributes {stable_mosaic.version = 11 : i64} {
  func.func @_adaptor_gate_kernel(%arg0: i32, %arg1: memref<16x128xbf16, #tpu.memory_space<vmem>>, %arg2: memref<128x128xbf16, #tpu.memory_space<vmem>>, %arg3: memref<128x256xbf16, #tpu.memory_space<vmem>>, %arg4: memref<128x256xbf16, #tpu.memory_space<vmem>>, %arg5: memref<2x256xf32, #tpu.memory_space<vmem>>, %arg6: memref<16x256xf32, #tpu.memory_space<vmem>>) attributes {dimension_semantics = [#tpu.dimension_semantics<arbitrary>], iteration_bounds = array<i64: 1>, scalar_prefetch = 0 : i64, scratch_operands = 0 : i64, tpu.core_type = #tpu.core_type<tc>, window_params = [{pipeline_mode = #tpu.pipeline_mode<synchronous>, transform_indices = @transform_0, window_bounds = array<i64: 16, 128>}, {pipeline_mode = #tpu.pipeline_mode<synchronous>, transform_indices = @transform_1, window_bounds = array<i64: 128, 128>}, {transform_indices = @transform_2, window_bounds = array<i64: 128, 256>}, {transform_indices = @transform_3, window_bounds = array<i64: 128, 256>}, {transform_indices = @transform_4, window_bounds = array<i64: 2, 256>}, {transform_indices = @transform_5, window_bounds = array<i64: 16, 256>}]} {
    %c0 = arith.constant 0 : index
    %c0_0 = arith.constant 0 : index
    %0 = vector.load %arg1[%c0, %c0_0] : memref<16x128xbf16, #tpu.memory_space<vmem>>, vector<16x128xbf16>
    %c0_1 = arith.constant 0 : index
    %c0_2 = arith.constant 0 : index
    %1 = vector.load %arg2[%c0_1, %c0_2] : memref<128x128xbf16, #tpu.memory_space<vmem>>, vector<128x128xbf16>
    %cst = arith.constant dense<0.000000e+00> : vector<16x128xf32>
    %2 = tpu.matmul %0, %1, %cst {dimension_numbers = #tpu.dot_dimension_numbers<[1], [0], [0], [1], [0, 0, 1, 1], [], []>} : vector<16x128xbf16>, vector<128x128xbf16>, vector<16x128xf32> -> vector<16x128xf32>
    %3 = math.tanh %2 : vector<16x128xf32>
    %c0_3 = arith.constant 0 : index
    %c0_4 = arith.constant 0 : index
    %4 = vector.load %arg3[%c0_3, %c0_4] : memref<128x256xbf16, #tpu.memory_space<vmem>>, vector<128x256xbf16>
    %cst_5 = arith.constant dense<0.000000e+00> : vector<16x256xf32>
    %5 = tpu.matmul %0, %4, %cst_5 {dimension_numbers = #tpu.dot_dimension_numbers<[1], [0], [0], [1], [0, 0, 1, 1], [], []>} : vector<16x128xbf16>, vector<128x256xbf16>, vector<16x256xf32> -> vector<16x256xf32>
    %6 = arith.truncf %3 : vector<16x128xf32> to vector<16x128xbf16>
    %c0_6 = arith.constant 0 : index
    %c0_7 = arith.constant 0 : index
    %7 = vector.load %arg4[%c0_6, %c0_7] : memref<128x256xbf16, #tpu.memory_space<vmem>>, vector<128x256xbf16>
    %cst_8 = arith.constant dense<0.000000e+00> : vector<16x256xf32>
    %8 = tpu.matmul %6, %7, %cst_8 {dimension_numbers = #tpu.dot_dimension_numbers<[1], [0], [0], [1], [0, 0, 1, 1], [], []>} : vector<16x128xbf16>, vector<128x256xbf16>, vector<16x256xf32> -> vector<16x256xf32>
    %9 = arith.addf %5, %8 : vector<16x256xf32>
    %c0_9 = arith.constant 0 : index
    %c0_10 = arith.constant 0 : index
    %10 = vector.load %arg5[%c0_9, %c0_10] : memref<2x256xf32, #tpu.memory_space<vmem>>, vector<1x256xf32>
    %11 = vector.broadcast %10 : vector<1x256xf32> to vector<16x256xf32>
    %12 = arith.addf %9, %11 : vector<16x256xf32>
    %13 = arith.negf %12 : vector<16x256xf32>
    %14 = math.exp %13 : vector<16x256xf32>
    %cst_11 = arith.constant 1.000000e+00 : f32
    %15 = vector.broadcast %cst_11 : f32 to vector<16x256xf32>
    %16 = arith.addf %15, %14 : vector<16x256xf32>
    %17 = arith.divf %15, %16 : vector<16x256xf32>
    %c1 = arith.constant 1 : index
    %c0_12 = arith.constant 0 : index
    %18 = vector.load %arg5[%c1, %c0_12] : memref<2x256xf32, #tpu.memory_space<vmem>>, vector<1x256xf32>
    %19 = vector.broadcast %18 : vector<1x256xf32> to vector<16x256xf32>
    %20 = arith.mulf %17, %19 : vector<16x256xf32>
    %c0_13 = arith.constant 0 : index
    %c0_14 = arith.constant 0 : index
    %21 = vector.load %arg6[%c0_13, %c0_14] : memref<16x256xf32, #tpu.memory_space<vmem>>, vector<16x256xf32>
    tpu.vector_store %arg6[%c0_13, %c0_14], %20 {strides = array<i32>} : memref<16x256xf32, #tpu.memory_space<vmem>>, vector<16x256xf32>,
    return
  }
  func.func @transform_0(%arg0: i32) -> (i32, i32) {
    %c0_i32 = arith.constant 0 : i32
    %c0_i32_0 = arith.constant 0 : i32
    %c0_i32_1 = arith.constant 0 : i32
    return %c0_i32, %c0_i32_0 : i32, i32
  }
  func.func @transform_1(%arg0: i32) -> (i32, i32) {
    %c0_i32 = arith.constant 0 : i32
    %c0_i32_0 = arith.constant 0 : i32
    %c0_i32_1 = arith.constant 0 : i32
    return %c0_i32, %c0_i32_0 : i32, i32
  }
  func.func @transform_2(%arg0: i32) -> (i32, i32) {
    %c0_i32 = arith.constant 0 : i32
    %c0_i32_0 = arith.constant 0 : i32
    return %c0_i32, %arg0 : i32, i32
  }
  func.func @transform_3(%arg0: i32) -> (i32, i32) {
    %c0_i32 = arith.constant 0 : i32
    %c0_i32_0 = arith.constant 0 : i32
    return %c0_i32, %arg0 : i32, i32
  }
  func.func @transform_4(%arg0: i32) -> (i32, i32) {
    %c0_i32 = arith.constant 0 : i32
    %c0_i32_0 = arith.constant 0 : i32
    return %c0_i32, %arg0 : i32, i32
  }
  func.func @transform_5(%arg0: i32) -> (i32, i32) {
    %c0_i32 = arith.constant 0 : i32
    %c0_i32_0 = arith.constant 0 : i32
    return %c0_i32, %arg0 : i32, i32
  }
}

</mosaic_0001>

<bundles_post_ra>
// kernel: squeeze.14
= control target key start
LH: loop header
LB: loop body
LE: loop exit
PB: predicated region body
PF: predicated region fallthrough
CT: control target
= control target key end

     0   :  { %s42_s8 = smov 124   ;;  %vm7_vm0 = vcmask 31744   ;;  %s43_s11 = smov 112   ;;  %s78_s0 = inlined_call_operand.vmem [shape: f32[20], index: 0, kind: input, shape index: {}]   ;;  %s79_s1 = inlined_call_operand.vmem [shape: f32[5,4], index: 1, kind: output, shape index: {}]  }
   0x1   :  { %v4_v0 = vld [vmem:[%s78_s0] sm:$0x1]  ;;  %s41_s0 = smov 116   ;;  %s44_s12 = smov 120  }
   0x2   :  { %5 = vst [vmem:[#allocation0] sm:$0x1] %v4_v0 }
   0x9   :  { %v21_v1 = vld [vmem:[#allocation0] sm:$0x1]  }
   0xa   :  { %v9_v2 = vld [vmem:[#allocation0] sm:$0x1]   ;;  %22 = vrot.lane.b32.xlu1 %v21_v1, %s41_s0 }
   0xb   :  { %10 = vrot.lane.b32.xlu0 %v9_v2, %s42_s8  ;;  %v6_v3 = vld [vmem:[#allocation0] sm:$0x1]  }
   0xc   :  { %v27_v4 = vld [vmem:[#allocation0] sm:$0x1]   ;;  %8 = vst.msk [vmem:[%s79_s1] sm:$0x1] %vm7_vm0, %v6_v3  }
   0xd   :  { %v15_v5 = vld [vmem:[#allocation0] sm:$0x1]  }
   0xe   :  { %28 = vrot.lane.b32.xlu1 %v27_v4, %s43_s11 }
   0xf   :  { %16 = vrot.lane.b32.xlu0 %v15_v5, %s44_s12 }
  0x7c   :  { %v23_v6 = vpop.permute.xlu1 %22  }
  0x7d   :  { %v11_v7 = vpop.permute.xlu0 %10   ;;  %35 = vst.msk [vmem:[%s79_s1 + $0x3] sm:$0x1] %vm7_vm0, %v23_v6  }
  0x7e   :  { %33 = vst.msk [vmem:[%s79_s1 + $0x1] sm:$0x1] %vm7_vm0, %v11_v7  }
  0x80   :  { %v29_v8 = vpop.permute.xlu1 %28  }
  0x81   :  { %v17_v9 = vpop.permute.xlu0 %16   ;;  %36 = vst.msk [vmem:[%s79_s1 + $0x4] sm:$0x1] %vm7_vm0, %v29_v8  }
  0x82   :  { %34 = vst.msk [vmem:[%s79_s1 + $0x2] sm:$0x1] %vm7_vm0, %v17_v9  }

// kernel: squeeze.12
= control target key start
LH: loop header
LB: loop body
LE: loop exit
PB: predicated region body
PF: predicated region fallthrough
CT: control target
= control target key end

     0   :  { %s347_s8 = smov 125   ;;  %s348_s9 = smov 116   ;;  %vm7_vm0 = vcmask 23552   ;;  %s466_s0 = inlined_call_operand.vmem [shape: f32[108], index: 0, kind: input, shape index: {}]   ;;  %s467_s1 = inlined_call_operand.vmem [shape: f32[4,3,3,3], index: 1, kind: output, shape index: {}]  }
   0x1   :  { %v4_v0 = vld [vmem:[%s466_s0] sm:$0x1]  ;;  %s346_s0 = smov 119   ;;  %s349_s10 = smov 122  }
   0x2   :  { %5 = vst [vmem:[#allocation1] sm:$0x1] %v4_v0  ;;  %s350_s11 = smov 110   ;;  %s351_s12 = smov 113  }
   0x3   :  { %s352_s13 = smov 104   ;;  %s353_s14 = smov 107  }
   0x4   :  { %s354_s15 = smov 98   ;;  %s355_s16 = smov 101  }
   0x5   :  { %s356_s17 = smov 92   ;;  %s357_s18 = smov 95  }
   0x6   :  { %s358_s19 = smov 86   ;;  %s359_s20 = smov 89  }
   0x7   :  { %s360_s21 = smov 80   ;;  %s361_s22 = smov 83  }
   0x8   :  { %s362_s23 = smov 74   ;;  %s363_s24 = smov 77  }
   0x9   :  { %v21_v1 = vld [vmem:[#allocation1] sm:$0x1]   ;;  %s364_s25 = smov 68   ;;  %s365_s26 = smov 71  }
   0xa   :  { %v9_v2 = vld [vmem:[#allocation1] sm:$0x1]   ;;  %22 = vrot.lane.b32.xlu1 %v21_v1, %s346_s0  ;;  %s366_s27 = smov 62   ;;  %s367_s28 = smov 65  }
   0xb   :  { %10 = vrot.lane.b32.xlu0 %v9_v2, %s347_s8  ;;  %v27_v3 = vld [vmem:[#allocation1] sm:$0x1]   ;;  %s368_s29 = smov 56   ;;  %s369_s30 = smov 59  }
   0xc   :  { %v15_v4 = vld [vmem:[#allocation1] sm:$0x1]   ;;  %s370_s2 = smov 50   ;;  %s371_s3 = smov 53  }
   0xd   :  { %v39_v5 = vld [vmem:[#allocation1] sm:$0x1]   ;;  %s372_s4 = smov 44   ;;  %s373_s5 = smov 47  }
   0xe   :  { %28 = vrot.lane.b32.xlu1 %v27_v3, %s348_s9  ;;  %v33_v6 = vld [vmem:[#allocation1] sm:$0x1]   ;;  %s374_s6 = smov 38   ;;  %s375_s7 = smov 41  }
   0xf   :  { %16 = vrot.lane.b32.xlu0 %v15_v4, %s349_s10  ;;  %v51_v7 = vld [vmem:[#allocation1] sm:$0x1]   ;;  %s376_s0 = smov 32   ;;  %s377_s8 = smov 35  }
  0x10   :  { %v45_v8 = vld [vmem:[#allocation1] sm:$0x1]   ;;  %s378_s9 = smov 29   ;;  %s379_s10 = smov 26  }
  0x11   :  { %v63_v9 = vld [vmem:[#allocation1] sm:$0x1]  }
  0x12   :  { %40 = vrot.lane.b32.xlu1 %v39_v5, %s350_s11  ;;  %v57_v10 = vld [vmem:[#allocation1] sm:$0x1]   ;;  %s380_s11 = smov 23  }
  0x13   :  { %34 = vrot.lane.b32.xlu0 %v33_v6, %s351_s12  ;;  %v6_v11 = vld [vmem:[#allocation1] sm:$0x1]  }
  0x14   :  { %8 = vst.msk [vmem:[#allocation0] sm:$0x1] %vm7_vm0, %v6_v11   ;;  %v75_v12 = vld [vmem:[#allocation1] sm:$0x1]  }
  0x15   :  { %v69_v13 = vld [vmem:[#allocation1] sm:$0x1]  }
  0x16   :  { %52 = vrot.lane.b32.xlu1 %v51_v7, %s352_s13  ;;  %v87_v14 = vld [vmem:[#allocation1] sm:$0x1]  }
  0x17   :  { %46 = vrot.lane.b32.xlu0 %v45_v8, %s353_s14  ;;  %v81_v15 = vld [vmem:[#allocation1] sm:$0x1]  }
  0x18   :  { %v99_v16 = vld [vmem:[#allocation1] sm:$0x1]  }
  0x19   :  { %v93_v17 = vld [vmem:[#allocation1] sm:$0x1]  }
  0x1a   :  { %64 = vrot.lane.b32.xlu1 %v63_v9, %s354_s15  ;;  %v111_v18 = vld [vmem:[#allocation1] sm:$0x1]  }
  0x1b   :  { %58 = vrot.lane.b32.xlu0 %v57_v10, %s355_s16  ;;  %v105_v19 = vld [vmem:[#allocation1] sm:$0x1]  }
  0x1c   :  { %v123_v20 = vld [vmem:[#allocation1] sm:$0x1]  }
  0x1d   :  { %v117_v21 = vld [vmem:[#allocation1] sm:$0x1]  }
  0x1e   :  { %76 = vrot.lane.b32.xlu1 %v75_v12, %s356_s17  ;;  %v135_v22 = vld [vmem:[#allocation1] sm:$0x1]  }
  0x1f   :  { %70 = vrot.lane.b32.xlu0 %v69_v13, %s357_s18  ;;  %v129_v23 = vld [vmem:[#allocation1] sm:$0x1]  }
  0x20   :  { %v147_v24 = vld [vmem:[#allocation1] sm:$0x1]  }
  0x21   :  { %v141_v25 = vld [vmem:[#allocation1] sm:$0x1]  }
  0x22   :  { %88 = vrot.lane.b32.xlu1 %v87_v14, %s358_s19  ;;  %v159_v26 = vld [vmem:[#allocation1] sm:$0x1]  }
  0x23   :  { %82 = vrot.lane.b32.xlu0 %v81_v15, %s359_s20  ;;  %v153_v27 = vld [vmem:[#allocation1] sm:$0x1]  }
  0x24   :  { %v171_v28 = vld [vmem:[#allocation1] sm:$0x1]  }
  0x25   :  { %v165_v29 = vld [vmem:[#allocation1] sm:$0x1]  }
  0x26   :  { %100 = vrot.lane.b32.xlu1 %v99_v16, %s360_s21  ;;  %v183_v30 = vld [vmem:[#allocation1] sm:$0x1]  }
  0x27   :  { %94 = vrot.lane.b32.xlu0 %v93_v17, %s361_s22  ;;  %v177_v31 = vld [vmem:[#allocation1] sm:$0x1]  }
  0x28   :  { %v195_v32 = vld [vmem:[#allocation1] sm:$0x1]  }
  0x29   :  { %v189_v33 = vld [vmem:[#allocation1] sm:$0x1]  }
  0x2a   :  { %112 = vrot.lane.b32.xlu1 %v111_v18, %s362_s23  ;;  %v201_v34 = vld [vmem:[#allocation1] sm:$0x1]  }
  0x2b   :  { %106 = vrot.lane.b32.xlu0 %v105_v19, %s363_s24  ;;  %v207_v35 = vld [vmem:[#allocation1] sm:$0x1]  }
  0x2c   :  { %v213_v36 = vld [vmem:[#allocation1] sm:$0x1]  }
  0x2e   :  { %124 = vrot.lane.b32.xlu1 %v123_v20, %s364_s25 }
  0x2f   :  { %118 = vrot.lane.b32.xlu0 %v117_v21, %s365_s26 }
  0x32   :  { %136 = vrot.lane.b32.xlu1 %v135_v22, %s366_s27 }
  0x33   :  { %130 = vrot.lane.b32.xlu0 %v129_v23, %s367_s28 }
  0x36   :  { %148 = vrot.lane.b32.xlu1 %v147_v24, %s368_s29 }
  0x37   :  { %142 = vrot.lane.b32.xlu0 %v141_v25, %s369_s30 }
  0x3a   :  { %160 = vrot.lane.b32.xlu1 %v159_v26, %s370_s2 }
  0x3b   :  { %154 = vrot.lane.b32.xlu0 %v153_v27, %s371_s3 }
  0x3e   :  { %172 = vrot.lane.b32.xlu1 %v171_v28, %s372_s4 }
  0x3f   :  { %166 = vrot.lane.b32.xlu0 %v165_v29, %s373_s5 }
  0x42   :  { %184 = vrot.lane.b32.xlu1 %v183_v30, %s374_s6 }
  0x43   :  { %178 = vrot.lane.b32.xlu0 %v177_v31, %s375_s7 }
  0x46   :  { %196 = vrot.lane.b32.xlu1 %v195_v32, %s376_s0 }
  0x47   :  { %190 = vrot.lane.b32.xlu0 %v189_v33, %s377_s8 }
  0x4a   :  { %208 = vrot.lane.b32.xlu1 %v207_v35, %s379_s10 }
  0x4b   :  { %202 = vrot.lane.b32.xlu0 %v201_v34, %s378_s9 }
  0x4f   :  { %214 = vrot.lane.b32.xlu0 %v213_v36, %s380_s11 }
  0x7c   :  { %v23_v37 = vpop.permute.xlu1 %22  }
  0x7d   :  { %v11_v38 = vpop.permute.xlu0 %10   ;;  %26 = vst.msk [vmem:[#allocation0 + $0x8] sm:$0x1] %vm7_vm0, %v23_v37  }
  0x7e   :  { %14 = vst.msk [vmem:[#allocation0 + $0x1] sm:$0x1] %vm7_vm0, %v11_v38  }
  0x80   :  { %v29_v39 = vpop.permute.xlu1 %28  }
  0x81   :  { %v17_v40 = vpop.permute.xlu0 %16   ;;  %32 = vst.msk [vmem:[#allocation0 + $0x9] sm:$0x1] %vm7_vm0, %v29_v39  }
  0x82   :  { %20 = vst.msk [vmem:[#allocation0 + $0x2] sm:$0x1] %vm7_vm0, %v17_v40  }
  0x84   :  { %v41_v41 = vpop.permute.xlu1 %40  }
  0x85   :  { %v35_v42 = vpop.permute.xlu0 %34   ;;  %44 = vst.msk [vmem:[#allocation0 + $0x10] sm:$0x1] %vm7_vm0, %v41_v41  }
  0x86   :  { %38 = vst.msk [vmem:[#allocation0 + $0xa] sm:$0x1] %vm7_vm0, %v35_v42  }
  0x88   :  { %v53_v44 = vpop.permute.xlu1 %52  }
  0x89   :  { %v222_v43 = vld [vmem:[#allocation0] sm:$0xf]  ;;  %v47_v45 = vpop.permute.xlu0 %46   ;;  %56 = vst.msk [vmem:[#allocation0 + $0x12] sm:$0x1] %vm7_vm0, %v53_v44  }
  0x8a   :  { %224 = vst [vmem:[%s467_s1] sm:$0xf] %v222_v43  ;;  %50 = vst.msk [vmem:[#allocation0 + $0x11] sm:$0x1] %vm7_vm0, %v47_v45  }
  0x8c   :  { %v65_v47 = vpop.permute.xlu1 %64  }
  0x8d   :  { %v226_v46 = vld [vmem:[#allocation0 + $0x8] sm:$0xf]  ;;  %v59_v48 = vpop.permute.xlu0 %58   ;;  %68 = vst.msk [vmem:[#allocation0 + $0x19] sm:$0x1] %vm7_vm0, %v65_v47  }
  0x8e   :  { %300 = vst [vmem:[%s467_s1 + $0x4] sm:$0xf] %v226_v46  ;;  %62 = vst.msk [vmem:[#allocation0 + $0x18] sm:$0x1] %vm7_vm0, %v59_v48  }
  0x90   :  { %v77_v50 = vpop.permute.xlu1 %76  }
  0x91   :  { %v231_v49 = vld [vmem:[#allocation0 + $0x10] sm:$0xf]  ;;  %v71_v51 = vpop.permute.xlu0 %70   ;;  %80 = vst.msk [vmem:[#allocation0 + $0x20] sm:$0x1] %vm7_vm0, %v77_v50  }
  0x92   :  { %301 = vst [vmem:[%s467_s1 + $0x8] sm:$0xf] %v231_v49  ;;  %74 = vst.msk [vmem:[#allocation0 + $0x1a] sm:$0x1] %vm7_vm0, %v71_v51  }
  0x94   :  { %v89_v52 = vpop.permute.xlu1 %88  }
  0x95   :  { %v83_v53 = vpop.permute.xlu0 %82   ;;  %92 = vst.msk [vmem:[#allocation0 + $0x22] sm:$0x1] %vm7_vm0, %v89_v52  }
  0x96   :  { %86 = vst.msk [vmem:[#allocation0 + $0x21] sm:$0x1] %vm7_vm0, %v83_v53  }
  0x98   :  { %v101_v55 = vpop.permute.xlu1 %100  }
  0x99   :  { %v237_v54 = vld [vmem:[#allocation0 + $0x18] sm:$0xf]  ;;  %v95_v56 = vpop.permute.xlu0 %94   ;;  %104 = vst.msk [vmem:[#allocation0 + $0x29] sm:$0x1] %vm7_vm0, %v101_v55  }
  0x9a   :  { %302 = vst [vmem:[%s467_s1 + $0xc] sm:$0xf] %v237_v54  ;;  %98 = vst.msk [vmem:[#allocation0 + $0x28] sm:$0x1] %vm7_vm0, %v95_v56  }
  0x9c   :  { %v113_v58 = vpop.permute.xlu1 %112  }
  0x9d   :  { %v243_v57 = vld [vmem:[#allocation0 + $0x20] sm:$0xf]  ;;  %v107_v59 = vpop.permute.xlu0 %106   ;;  %116 = vst.msk [vmem:[#allocation0 + $0x30] sm:$0x1] %vm7_vm0, %v113_v58  }
  0x9e   :  { %303 = vst [vmem:[%s467_s1 + $0x10] sm:$0xf] %v243_v57  ;;  %110 = vst.msk [vmem:[#allocation0 + $0x2a] sm:$0x1] %vm7_vm0, %v107_v59  }
  0xa0   :  { %v125_v60 = vpop.permute.xlu1 %124  }
  0xa1   :  { %v119_v61 = vpop.permute.xlu0 %118   ;;  %128 = vst.msk [vmem:[#allocation0 + $0x32] sm:$0x1] %vm7_vm0, %v125_v60  }
  0xa2   :  { %122 = vst.msk [vmem:[#allocation0 + $0x31] sm:$0x1] %vm7_vm0, %v119_v61  }
  0xa4   :  { %v137_v63 = vpop.permute.xlu1 %136  }
  0xa5   :  { %v249_v62 = vld [vmem:[#allocation0 + $0x28] sm:$0xf]  ;;  %v131_v0 = vpop.permute.xlu0 %130   ;;  %140 = vst.msk [vmem:[#allocation0 + $0x39] sm:$0x1] %vm7_vm0, %v137_v63  }
  0xa6   :  { %304 = vst [vmem:[%s467_s1 + $0x14] sm:$0xf] %v249_v62  ;;  %134 = vst.msk [vmem:[#allocation0 + $0x38] sm:$0x1] %vm7_vm0, %v131_v0  }
  0xa8   :  { %v149_v2 = vpop.permute.xlu1 %148  }
  0xa9   :  { %v255_v1 = vld [vmem:[#allocation0 + $0x30] sm:$0xf]  ;;  %v143_v3 = vpop.permute.xlu0 %142   ;;  %152 = vst.msk [vmem:[#allocation0 + $0x40] sm:$0x1] %vm7_vm0, %v149_v2  }
  0xaa   :  { %305 = vst [vmem:[%s467_s1 + $0x18] sm:$0xf] %v255_v1  ;;  %146 = vst.msk [vmem:[#allocation0 + $0x3a] sm:$0x1] %vm7_vm0, %v143_v3  }
  0xac   :  { %v161_v4 = vpop.permute.xlu1 %160  }
  0xad   :  { %v155_v5 = vpop.permute.xlu0 %154   ;;  %164 = vst.msk [vmem:[#allocation0 + $0x42] sm:$0x1] %vm7_vm0, %v161_v4  }
  0xae   :  { %158 = vst.msk [vmem:[#allocation0 + $0x41] sm:$0x1] %vm7_vm0, %v155_v5  }
  0xb0   :  { %v173_v7 = vpop.permute.xlu1 %172  }
  0xb1   :  { %v261_v6 = vld [vmem:[#allocation0 + $0x38] sm:$0xf]  ;;  %v167_v8 = vpop.permute.xlu0 %166   ;;  %176 = vst.msk [vmem:[#allocation0 + $0x49] sm:$0x1] %vm7_vm0, %v173_v7  }
  0xb2   :  { %306 = vst [vmem:[%s467_s1 + $0x1c] sm:$0xf] %v261_v6  ;;  %170 = vst.msk [vmem:[#allocation0 + $0x48] sm:$0x1] %vm7_vm0, %v167_v8  }
  0xb4   :  { %v185_v10 = vpop.permute.xlu1 %184  }
  0xb5   :  { %v267_v9 = vld [vmem:[#allocation0 + $0x40] sm:$0xf]  ;;  %v179_v11 = vpop.permute.xlu0 %178   ;;  %188 = vst.msk [vmem:[#allocation0 + $0x50] sm:$0x1] %vm7_vm0, %v185_v10  }
  0xb6   :  { %307 = vst [vmem:[%s467_s1 + $0x20] sm:$0xf] %v267_v9  ;;  %182 = vst.msk [vmem:[#allocation0 + $0x4a] sm:$0x1] %vm7_vm0, %v179_v11  }
  0xb8   :  { %v197_v12 = vpop.permute.xlu1 %196  }
  0xb9   :  { %v191_v13 = vpop.permute.xlu0 %190   ;;  %200 = vst.msk [vmem:[#allocation0 + $0x52] sm:$0x1] %vm7_vm0, %v197_v12  }
  0xba   :  { %194 = vst.msk [vmem:[#allocation0 + $0x51] sm:$0x1] %vm7_vm0, %v191_v13  }
  0xbc   :  { %v209_v16 = vpop.permute.xlu1 %208  }
  0xbd   :  { %v273_v14 = vld [vmem:[#allocation0 + $0x48] sm:$0xf]  ;;  %v203_v15 = vpop.permute.xlu0 %202   ;;  %212 = vst.msk [vmem:[#allocation0 + $0x59] sm:$0x1] %vm7_vm0, %v209_v16  }
  0xbe   :  { %308 = vst [vmem:[%s467_s1 + $0x24] sm:$0xf] %v273_v14  ;;  %206 = vst.msk [vmem:[#allocation0 + $0x58] sm:$0x1] %vm7_vm0, %v203_v15  }
  0xc1   :  { %v279_v17 = vld [vmem:[#allocation0 + $0x50] sm:$0xf]  ;;  %v215_v18 = vpop.permute.xlu0 %214  }
  0xc2   :  { %309 = vst [vmem:[%s467_s1 + $0x28] sm:$0xf] %v279_v17  ;;  %218 = vst.msk [vmem:[#allocation0 + $0x5a] sm:$0x1] %vm7_vm0, %v215_v18  }
  0xc9   :  { %v285_v19 = vld [vmem:[#allocation0 + $0x58] sm:$0xf] }
  0xca   :  { %310 = vst [vmem:[%s467_s1 + $0x2c] sm:$0xf] %v285_v19 }

// kernel: _forward_core.1
= control target key start
LH: loop header
LB: loop body
LE: loop exit
PB: predicated region body
PF: predicated region fallthrough
CT: control target
= control target key end

     0   :  { %v639_v0 = vmov 0.0   ;;  %vm640_vm0 = vmmov 0   ;;  %v641_v25 = vmov 0   ;;  %v417_v50 = vlaneseq  ;;  %s813_s1 = inlined_call_operand.vmem [shape: bf16[128,128], index: 1, kind: input, shape index: {}]   ;;  %s814_s3 = inlined_call_operand.vmem [shape: bf16[128,256], index: 3, kind: input, shape index: {}]   ;;  %s815_s0 = inlined_call_operand.vmem [shape: bf16[16,128], index: 0, kind: input, shape index: {}]   ;;  %s816_s2 = inlined_call_operand.vmem [shape: bf16[128,256], index: 2, kind: input, shape index: {}]   ;;  %s817_s4 = inlined_call_operand.vmem [shape: f32[2,256], index: 4, kind: input, shape index: {}]   ;;  %s818_s5 = inlined_call_operand.vmem [shape: f32[16,256], index: 5, kind: output, shape index: {}]  }
   0x1   :  { %535 = vmatprep.subr.bf16.mxu0 %v639_v0  ;;  %v562_v1 = vld [vmem:[%s813_s1] sm:$0xff]   ;;  %551 = vmatprep.mubr.msk.bf16.mxu0 %vm640_vm0, %v639_v0  ;;  %v563_v2 = vld [vmem:[%s813_s1 + $0x8] sm:$0xff]   ;;  %v564_v3 = vld [vmem:[%s813_s1 + $0x10] sm:$0xff]  }
   0x2   :  { %536 = vmatpush3.bf16.msra.mxu0 %v562_v1  ;;  %v565_v4 = vld [vmem:[%s813_s1 + $0x18] sm:$0xff]   ;;  %v571_v5 = vld [vmem:[%s814_s3 + $0x4] ss:$8 sps:$4 sm:$0xff]   ;;  %v573_v6 = vld [vmem:[%s814_s3] ss:$8 sps:$4 sm:$0xff]   ;;  %281 = vmatprep.mubr.bf16.mxu1 %v641_v25  ;;  %v418_v51 = vshrl.u32 %v417_v50, 7 }
   0x3   :  { %537 = vmatprep.subr.bf16.mxu0 %v639_v0  ;;  %249 = vmatprep.subr.bf16.mxu1 %v571_v5  ;;  %v574_v7 = vld [vmem:[%s814_s3 + $0x14] ss:$8 sps:$4 sm:$0xff]   ;;  %v576_v8 = vld [vmem:[%s814_s3 + $0x10] ss:$8 sps:$4 sm:$0xff]   ;;  %v577_v9 = vld [vmem:[%s814_s3 + $0x24] ss:$8 sps:$4 sm:$0xff]  }
   0x4   :  { %250 = vmatpush1.bf16.msra.mxu1 %v573_v6  ;;  %v566_v10 = vld [vmem:[%s813_s1 + $0x20] sm:$0xff]   ;;  %v580_v12 = vld [vmem:[%s814_s3 + $0x34] ss:$8 sps:$4 sm:$0xff]   ;;  %v567_v13 = vld [vmem:[%s813_s1 + $0x28] sm:$0xff]   ;;  %v419_v52 = vsub.s32 0, %v418_v51  ;;  %v423_v54 = vsub.s32 1, %v418_v51 }
   0x5   :  { %251 = vmatprep.subr.bf16.mxu1 %v574_v7  ;;  %v579_v11 = vld [vmem:[%s814_s3 + $0x20] ss:$8 sps:$4 sm:$0xff]   ;;  %v582_v14 = vld [vmem:[%s814_s3 + $0x30] ss:$8 sps:$4 sm:$0xff]   ;;  %v583_v15 = vld [vmem:[%s814_s3 + $0x44] ss:$8 sps:$4 sm:$0xff]  }
   0x6   :  { %538 = vmatpush3.bf16.msra.mxu0 %v563_v2  ;;  %v568_v16 = vld [vmem:[%s813_s1 + $0x30] sm:$0xff]   ;;  %v569_v17 = vld [vmem:[%s813_s1 + $0x38] sm:$0xff]   ;;  %v570_v18 = vld [vmem:[%s815_s0] sm:$0xff]  }
   0x7   :  { %539 = vmatprep.subr.bf16.mxu0 %v639_v0  ;;  %v585_v19 = vld [vmem:[%s814_s3 + $0x40] ss:$8 sps:$4 sm:$0xff]   ;;  %v586_v20 = vld [vmem:[%s814_s3 + $0x54] ss:$8 sps:$4 sm:$0xff]   ;;  %v588_v21 = vld [vmem:[%s814_s3 + $0x50] ss:$8 sps:$4 sm:$0xff]  }
   0x8   :  { %252 = vmatpush1.bf16.msra.mxu1 %v576_v8  ;;  %v589_v22 = vld [vmem:[%s814_s3 + $0x64] ss:$8 sps:$4 sm:$0xff]   ;;  %v591_v23 = vld [vmem:[%s814_s3 + $0x60] ss:$8 sps:$4 sm:$0xff]   ;;  %v592_v24 = vld [vmem:[%s814_s3 + $0x74] ss:$8 sps:$4 sm:$0xff]  }
   0x9   :  { %253 = vmatprep.subr.bf16.mxu1 %v577_v9  ;;  %v594_v26 = vld [vmem:[%s814_s3 + $0x70] ss:$8 sps:$4 sm:$0xff]   ;;  %v597_v27 = vld [vmem:[%s816_s2 + $0x4] ss:$8 sps:$4 sm:$0xff]   ;;  %v595_v34 = vld [vmem:[%s816_s2] ss:$8 sps:$4 sm:$0xff]  }
   0xa   :  { %540 = vmatpush3.bf16.msra.mxu0 %v564_v3  ;;  %v600_v36 = vld [vmem:[%s816_s2 + $0x14] ss:$8 sps:$4 sm:$0xff]   ;;  %v598_v37 = vld [vmem:[%s816_s2 + $0x10] ss:$8 sps:$4 sm:$0xff]   ;;  %v603_v38 = vld [vmem:[%s816_s2 + $0x24] ss:$8 sps:$4 sm:$0xff]  }
   0xb   :  { %541 = vmatprep.subr.bf16.mxu0 %v639_v0  ;;  %v601_v39 = vld [vmem:[%s816_s2 + $0x20] ss:$8 sps:$4 sm:$0xff]   ;;  %v606_v40 = vld [vmem:[%s816_s2 + $0x34] ss:$8 sps:$4 sm:$0xff]   ;;  %v604_v41 = vld [vmem:[%s816_s2 + $0x30] ss:$8 sps:$4 sm:$0xff]  }
   0xc   :  { %254 = vmatpush1.bf16.msra.mxu1 %v579_v11  ;;  %v609_v42 = vld [vmem:[%s816_s2 + $0x44] ss:$8 sps:$4 sm:$0xff]   ;;  %v607_v43 = vld [vmem:[%s816_s2 + $0x40] ss:$8 sps:$4 sm:$0xff]   ;;  %v612_v44 = vld [vmem:[%s816_s2 + $0x54] ss:$8 sps:$4 sm:$0xff]  }
   0xd   :  { %255 = vmatprep.subr.bf16.mxu1 %v580_v12  ;;  %v610_v45 = vld [vmem:[%s816_s2 + $0x50] ss:$8 sps:$4 sm:$0xff]   ;;  %v615_v46 = vld [vmem:[%s816_s2 + $0x64] ss:$8 sps:$4 sm:$0xff]   ;;  %v613_v47 = vld [vmem:[%s816_s2 + $0x60] ss:$8 sps:$4 sm:$0xff]  }
   0xe   :  { %542 = vmatpush3.bf16.msra.mxu0 %v565_v4  ;;  %v618_v48 = vld [vmem:[%s816_s2 + $0x74] ss:$8 sps:$4 sm:$0xff]   ;;  %v616_v49 = vld [vmem:[%s816_s2 + $0x70] ss:$8 sps:$4 sm:$0xff]  }
   0xf   :  { %543 = vmatprep.subr.bf16.mxu0 %v639_v0  ;;  %v415_v53 = vld [vmem:[%s817_s4] ss:$2 sm:$0x3] }
  0x10   :  { %256 = vmatpush1.bf16.msra.mxu1 %v582_v14  ;;  %v420_v55 = vrot.slane %v415_v53, %v419_v52  ;;  %v424_v56 = vrot.slane %v415_v53, %v423_v54 }
  0x11   :  { %257 = vmatprep.subr.bf16.mxu1 %v583_v15 }
  0x12   :  { %544 = vmatpush3.bf16.msra.mxu0 %v566_v10 }
  0x13   :  { %545 = vmatprep.subr.bf16.mxu0 %v639_v0 }
  0x14   :  { %258 = vmatpush1.bf16.msra.mxu1 %v585_v19 }
  0x15   :  { %259 = vmatprep.subr.bf16.mxu1 %v586_v20 }
  0x16   :  { %546 = vmatpush3.bf16.msra.mxu0 %v567_v13  ;;  %v525_v13 = vld [vmem:[%s817_s4 + $0x1] ss:$2 sm:$0x3] }
  0x17   :  { %547 = vmatprep.subr.bf16.mxu0 %v639_v0  ;;  %v461_v14 = vrot.slane %v525_v13, %v419_v52  ;;  %v465_v15 = vrot.slane %v525_v13, %v423_v54 }
  0x18   :  { %260 = vmatpush1.bf16.msra.mxu1 %v588_v21 }
  0x19   :  { %261 = vmatprep.subr.bf16.mxu1 %v589_v22 }
  0x1a   :  { %548 = vmatpush3.bf16.msra.mxu0 %v568_v16 }
  0x1b   :  { %549 = vmatprep.subr.bf16.mxu0 %v639_v0 }
  0x1c   :  { %262 = vmatpush1.bf16.msra.mxu1 %v591_v23 }
  0x1d   :  { %263 = vmatprep.subr.bf16.mxu1 %v592_v24 }
  0x1e   :  { %550 = vmatpush3.bf16.msra.mxu0 %v569_v17 }
  0x20   :  { %264 = vmatpush1.bf16.msra.mxu1 %v594_v26 }
  0x21   :  { %552 = vmatmul.mubr.bf16.vlgmr.msra.gmra.mrb[0].mxu0 %v570_v18  ;;  %372 = vmatprep.subr.bf16.mxu1 %v597_v27 }
  0xf4   :  { %v127_v28 = vpop.f32.mrb[0].mxu0 }
  0xf5   :  { %v553_v29 = vpop.f32.mrb[1].mxu0  ;;  %619 = vtanh.f32 %v127_v28 }
  0xf6   :  { %v130_v30 = vpop.f32.mrb[2].mxu0 }
  0xf7   :  { %621 = vtanh.f32 %v130_v30  ;;  %v554_v31 = vpop.f32.mrb[3].mxu0 }
  0xff   :  { %v620_v32 = vpop.eup %619 }
 0x101   :  { %v622_v33 = vpop.eup %621 }
 0x102   :  { %v152_v35 = vpack.c.bf16 %v622_v33, %v620_v32 }
 0x104   :  { %282 = vmatmul.mubr.bf16.vlgmr.msra.gmra.mrb[0].mxu1 %v152_v35 }
 0x105   :  { %373 = vmatpush1.bf16.msra.mxu1 %v595_v34  ;;  %404 = vmatprep.mubr.bf16.mxu1 %v641_v25 }
 0x106   :  { %374 = vmatprep.subr.bf16.mxu1 %v600_v36 }
 0x109   :  { %375 = vmatpush1.bf16.msra.mxu1 %v598_v37 }
 0x10a   :  { %376 = vmatprep.subr.bf16.mxu1 %v603_v38 }
 0x10d   :  { %377 = vmatpush1.bf16.msra.mxu1 %v601_v39 }
 0x10e   :  { %378 = vmatprep.subr.bf16.mxu1 %v606_v40 }
 0x111   :  { %379 = vmatpush1.bf16.msra.mxu1 %v604_v41 }
 0x112   :  { %380 = vmatprep.subr.bf16.mxu1 %v609_v42 }
 0x115   :  { %381 = vmatpush1.bf16.msra.mxu1 %v607_v43 }
 0x116   :  { %382 = vmatprep.subr.bf16.mxu1 %v612_v44 }
 0x119   :  { %383 = vmatpush1.bf16.msra.mxu1 %v610_v45 }
 0x11a   :  { %384 = vmatprep.subr.bf16.mxu1 %v615_v46 }
 0x11d   :  { %385 = vmatpush1.bf16.msra.mxu1 %v613_v47 }
 0x11e   :  { %386 = vmatprep.subr.bf16.mxu1 %v618_v48 }
 0x121   :  { %387 = vmatpush1.bf16.msra.mxu1 %v616_v49 }
 0x124   :  { %405 = vmatmul.mubr.bf16.vlgmr.msra.gmra.mrb[0].mxu1 %v570_v18 }
 0x1f7   :  { %v406_v57 = vpop.f32.mrb[0].mxu1 }
 0x1f8   :  { %v427_v58 = vadd.f32 %v420_v55, %v406_v57  ;;  %v408_v59 = vpop.f32.mrb[1].mxu1 }
 0x1f9   :  { %v428_v60 = vadd.f32 %v424_v56, %v408_v59  ;;  %v410_v61 = vpop.f32.mrb[2].mxu1 }
 0x1fa   :  { %v521_v62 = vmul.f32 -1.442695, %v427_v58  ;;  %v429_v63 = vadd.f32 %v420_v55, %v410_v61  ;;  %v412_v0 = vpop.f32.mrb[3].mxu1 }
 0x1fb   :  { %v522_v1 = vmul.f32 -1.442695, %v428_v60  ;;  %v430_v2 = vadd.f32 %v424_v56, %v412_v0 }
 0x1fc   :  { %623 = vpow2.f32 %v521_v62  ;;  %v523_v3 = vmul.f32 -1.442695, %v429_v63 }
 0x1fd   :  { %625 = vpow2.f32 %v522_v1  ;;  %v524_v4 = vmul.f32 -1.442695, %v430_v2 }
 0x1fe   :  { %627 = vpow2.f32 %v523_v3 }
 0x1ff   :  { %629 = vpow2.f32 %v524_v4 }
 0x206   :  { %v624_v5 = vpop.eup %623 }
 0x207   :  { %v626_v6 = vpop.eup %625  ;;  %v443_v7 = vadd.f32 1.0, %v624_v5 }
 0x208   :  { %v628_v8 = vpop.eup %627  ;;  %v444_v9 = vadd.f32 1.0, %v626_v6 }
 0x209   :  { %v630_v10 = vpop.eup %629  ;;  %631 = vrcp.f32 %v443_v7  ;;  %v445_v11 = vadd.f32 1.0, %v628_v8 }
 0x20a   :  { %633 = vrcp.f32 %v444_v9  ;;  %v446_v12 = vadd.f32 1.0, %v630_v10 }
 0x20b   :  { %635 = vrcp.f32 %v445_v11 }
 0x20c   :  { %637 = vrcp.f32 %v446_v12 }
 0x213   :  { %v632_v16 = vpop.eup %631 }
 0x214   :  { %v634_v17 = vpop.eup %633  ;;  %v468_v18 = vmul.f32 %v632_v16, %v461_v14 }
 0x215   :  { %v636_v19 = vpop.eup %635  ;;  %v469_v20 = vmul.f32 %v634_v17, %v465_v15 }
 0x216   :  { %v638_v21 = vpop.eup %637  ;;  %472 = vst [vmem:[%s818_s5] sm:$0xff] %v468_v18  ;;  %v470_v22 = vmul.f32 %v636_v19, %v461_v14 }
 0x217   :  { %473 = vst [vmem:[%s818_s5 + $0x8] sm:$0xff] %v469_v20  ;;  %v471_v23 = vmul.f32 %v638_v21, %v465_v15 }
 0x218   :  { %474 = vst [vmem:[%s818_s5 + $0x10] sm:$0xff] %v470_v22 }
 0x219   :  { %475 = vst [vmem:[%s818_s5 + $0x18] sm:$0xff] %v471_v23 }

</bundles_post_ra>
